<compile_context>
chip_gen: v6e
topology: v6e:2x2x1
jax: 0.10.0
libtpu: 0.0.40
codegen_flags: <defaults>
</compile_context>

<pallas_src>
import functools

import jax
import jax.numpy as jnp
from jax.experimental import pallas as pl
from jax.experimental.pallas import tpu as pltpu

MAX_ACTION = 1.0     # env.action_space.high[0] in the original script (synthetic)
PADH = 128           # lane width used for the hidden-layer padding
H1, H2 = 50, 20      # real hidden sizes of the PyTorch module


def _round_up(n, m):
    return ((n + m - 1) // m) * m


def _cdiv(a, b):
    return -(-a // b)


def actor_kernel(x_ref, w1_ref, b1_ref, w2_ref, b2_ref, w3_ref, b3_ref, o_ref,
                 *, max_action):
    # Layer 1: Linear + ReLU.  Narrow-K matmul (K = inp), f32 accumulate,
    # bias/activation in f32.  Padded hidden lanes: relu(0 + 0) = 0.
    w1 = w1_ref[...]
    h1 = jnp.dot(x_ref[...].astype(w1.dtype), w1,
                 preferred_element_type=jnp.float32) + b1_ref[...]
    h1 = jnp.maximum(h1, 0.0)

    # Layer 2: Linear + sigmoid.  sigmoid(x) = 0.5*(tanh(x/2)+1) -> EUP,
    # avoids the VPU f32 divide.  Padded lanes give sigmoid(0)=0.5, harmless
    # because the corresponding (padded) input rows of W3 are zero.
    w2 = w2_ref[...]
    h2 = jnp.dot(h1.astype(w2.dtype), w2,
                 preferred_element_type=jnp.float32) + b2_ref[...]
    h2 = 0.5 * (jnp.tanh(0.5 * h2) + 1.0)

    # Output layer: Linear -> tanh -> scale by max_action.  Narrow-N output.
    w3 = w3_ref[...]
    o = jnp.dot(h2.astype(w3.dtype), w3,
                preferred_element_type=jnp.float32) + b3_ref[...]
    o_ref[...] = (max_action * jnp.tanh(o)).astype(o_ref.dtype)


def init_params(key, inp, outp):
    """Mirror the PyTorch module: weights ~ N(0, 0.1); biases keep nn.Linear's
    default U(-1/sqrt(fan_in), 1/sqrt(fan_in)).  Weights stored transposed as
    (in_features, out_features); biases as (1, out_features)."""
    ks = jax.random.split(key, 6)

    def lin(kw, kb, fan_in, fan_out):
        w = 0.1 * jax.random.normal(kw, (fan_in, fan_out), dtype=jnp.float32)
        bound = 1.0 / jnp.sqrt(jnp.float32(fan_in))
        b = jax.random.uniform(kb, (1, fan_out), minval=-bound, maxval=bound,
                               dtype=jnp.float32)
        return w, b

    w1, b1 = lin(ks[0], ks[1], inp, H1)
    w2, b2 = lin(ks[2], ks[3], H1, H2)
    w3, b3 = lin(ks[4], ks[5], H2, outp)
    return {"w1": w1, "b1": b1, "w2": w2, "b2": b2, "w3": w3, "b3": b3}


def pad_params(params, weight_dtype=jnp.bfloat16):
    """Zero-pad only the hidden dims to 128 lanes, once, up front.

    Shapes:  w1 (inp,128)   b1 (1,128)
             w2 (128,128)   b2 (1,128)
             w3 (128,outp)  b3 (1,outp)
    Zero padding is required for correctness of the fused kernel (see kernel
    notes).  Weights may be stored in bf16 (MXU operands, f32 accumulate);
    biases stay f32 so all post-matmul math is f32 (v5e has no bf16 VALU/EUP).
    """
    assert H1 <= PADH and H2 <= PADH
    inp = params["w1"].shape[0]
    outp = params["w3"].shape[1]

    w1 = jnp.zeros((inp, PADH), jnp.float32).at[:, :H1].set(params["w1"])
    b1 = jnp.zeros((1, PADH), jnp.float32).at[:, :H1].set(params["b1"])
    w2 = jnp.zeros((PADH, PADH), jnp.float32).at[:H1, :H2].set(params["w2"])
    b2 = jnp.zeros((1, PADH), jnp.float32).at[:, :H2].set(params["b2"])
    w3 = jnp.zeros((PADH, outp), jnp.float32).at[:H2, :].set(params["w3"])
    b3 = params["b3"].astype(jnp.float32)

    return {
        "w1": w1.astype(weight_dtype), "b1": b1,
        "w2": w2.astype(weight_dtype), "b2": b2,
        "w3": w3.astype(weight_dtype), "b3": b3,
    }


@functools.partial(jax.jit, static_argnames=("block_b",))
def actor_forward(x, padded_params, *, block_b=2048):
    """x: (B, inp) float32.  padded_params: output of pad_params().
    Returns (B, outp) float32."""
    B, inp = x.shape
    p = padded_params
    assert p["w1"].shape[0] == inp, "padded params do not match input dim"
    outp = p["w3"].shape[1]
    w_itemsize = jnp.dtype(p["w1"].dtype).itemsize

    # Batch tile: multiple of 8 sublanes, large by default (amortize the
    # ~0.35us/grid-step overhead), capped at 4096 so double-buffered x/out
    # blocks plus the f32 (tb,128) intermediates stay well inside v7x's
    # 64 MiB physical VMEM.
    b8 = _round_up(max(B, 8), 8)
    tb = min(_round_up(block_b, 8), 4096, b8)
    nblk = _cdiv(b8, tb)
    # v7x dual-TC: with >1 block, prefer an even grid length so
    # dimension_semantics=("parallel",) splits evenly across the 2 TCs
    # (no-op on single-TC v5e/v6e).
    if nblk > 1 and nblk % 2 == 1:
        tb = _round_up(_cdiv(b8, nblk + 1), 8)
        nblk = _cdiv(b8, tb)
    bp = nblk * tb

    # Pad only the batch dim (rows are `inp` wide, so this is a few KiB at
    # most -- no 128-lane padding of x in HBM).
    xp = x.astype(jnp.float32)
    if bp != B:
        xp = jnp.zeros((bp, inp), jnp.float32).at[:B, :].set(xp)

    x_spec = pl.BlockSpec((tb, inp), lambda i: (i, 0))
    w1_spec = pl.BlockSpec((inp, PADH), lambda i: (0, 0))    # VMEM-resident
    w2_spec = pl.BlockSpec((PADH, PADH), lambda i: (0, 0))
    w3_spec = pl.BlockSpec((PADH, outp), lambda i: (0, 0))
    bh_spec = pl.BlockSpec((1, PADH), lambda i: (0, 0))
    b3_spec = pl.BlockSpec((1, outp), lambda i: (0, 0))
    o_spec = pl.BlockSpec((tb, outp), lambda i: (i, 0))

    # Advisory cost for XLA scheduling.
    flops = 2 * bp * (inp * PADH + PADH * PADH + PADH * outp)
    transcendentals = bp * (PADH + outp)                 # sigmoid-tanh + out tanh
    bytes_accessed = (bp * inp * 4 + bp * outp * 4
                      + (inp * PADH + PADH * PADH + PADH * outp) * w_itemsize
                      + (2 * PADH + outp) * 4)
    cost = pl.CostEstimate(flops=flops, transcendentals=transcendentals,
                           bytes_accessed=bytes_accessed)

    out = pl.pallas_call(
        functools.partial(actor_kernel, max_action=MAX_ACTION),
        out_shape=jax.ShapeDtypeStruct((bp, outp), jnp.float32),
        grid=(nblk,),
        in_specs=[x_spec, w1_spec, bh_spec, w2_spec, bh_spec, w3_spec, b3_spec],
        out_specs=o_spec,
        compiler_params=pltpu.CompilerParams(
            dimension_semantics=("parallel",),       # 2x on v7x dual-TC
            vmem_limit_bytes=32 * 1024 * 1024,       # safe on v5e/v6e/v7x
        ),
        cost_estimate=cost,
    )(xp, p["w1"], p["b1"], p["w2"], p["b2"], p["w3"], p["b3"])

    return out if bp == B else out[:B]


def actor_ref(x, p):
    """Pure-JAX reference (unpadded params) for correctness checks."""
    h1 = jnp.maximum(x @ p["w1"] + p["b1"], 0.0)
    h2 = jax.nn.sigmoid(h1 @ p["w2"] + p["b2"])
    return MAX_ACTION * jnp.tanh(h2 @ p["w3"] + p["b3"])


if __name__ == "__main__":
    key = jax.random.PRNGKey(0)
    k_params, k_x, k_x2 = jax.random.split(key, 3)

    B, INP, OUTP = 8, 4, 2  # small batch, state dim, action dim
    params = init_params(k_params, INP, OUTP)

    # f32-weight path, tiny batch (single grid step). Tight tolerance.
    padded_f32 = pad_params(params, weight_dtype=jnp.float32)
    x = jax.random.normal(k_x, (B, INP), dtype=jnp.float32)
    out = jax.block_until_ready(actor_forward(x, padded_f32))
    ref = actor_ref(x, params)
    assert out.shape == (B, OUTP)
    assert jnp.allclose(out, ref, atol=1e-5, rtol=1e-5), "f32 path mismatch vs reference"

    # Larger batch: exercises multiple grid steps, batch-tail padding, the
    # even-grid adjustment, and bf16 MXU weight operands (f32 accumulate).
    padded_bf16 = pad_params(params, weight_dtype=jnp.bfloat16)
    B2 = 300
    x2 = jax.random.normal(k_x2, (B2, INP), dtype=jnp.float32)
    out2 = jax.block_until_ready(actor_forward(x2, padded_bf16, block_b=128))
    ref2 = actor_ref(x2, params)
    assert out2.shape == (B2, OUTP)
    assert jnp.allclose(out2, ref2, atol=5e-2, rtol=5e-2), "bf16 path mismatch vs reference"

    print("KERNEL_OK")
</pallas_src>

<mosaic_0001>
module attributes {stable_mosaic.version = 11 : i64} {
  func.func @actor_kernel(%arg0: i32, %arg1: memref<8x4xf32, #tpu.memory_space<vmem>>, %arg2: memref<4x128xf32, #tpu.memory_space<vmem>>, %arg3: memref<1x128xf32, #tpu.memory_space<vmem>>, %arg4: memref<128x128xf32, #tpu.memory_space<vmem>>, %arg5: memref<1x128xf32, #tpu.memory_space<vmem>>, %arg6: memref<128x2xf32, #tpu.memory_space<vmem>>, %arg7: memref<1x2xf32, #tpu.memory_space<vmem>>, %arg8: memref<8x2xf32, #tpu.memory_space<vmem>>) attributes {dimension_semantics = [#tpu.dimension_semantics<parallel>], iteration_bounds = array<i64: 1>, scalar_prefetch = 0 : i64, scratch_operands = 0 : i64, tpu.core_type = #tpu.core_type<tc>, window_params = [{transform_indices = @transform_0, window_bounds = array<i64: 8, 4>}, {pipeline_mode = #tpu.pipeline_mode<synchronous>, transform_indices = @transform_1, window_bounds = array<i64: 4, 128>}, {pipeline_mode = #tpu.pipeline_mode<synchronous>, transform_indices = @transform_2, window_bounds = array<i64: 1, 128>}, {pipeline_mode = #tpu.pipeline_mode<synchronous>, transform_indices = @transform_3, window_bounds = array<i64: 128, 128>}, {pipeline_mode = #tpu.pipeline_mode<synchronous>, transform_indices = @transform_4, window_bounds = array<i64: 1, 128>}, {pipeline_mode = #tpu.pipeline_mode<synchronous>, transform_indices = @transform_5, window_bounds = array<i64: 128, 2>}, {pipeline_mode = #tpu.pipeline_mode<synchronous>, transform_indices = @transform_6, window_bounds = array<i64: 1, 2>}, {transform_indices = @transform_7, window_bounds = array<i64: 8, 2>}]} {
    %c0 = arith.constant 0 : index
    %c0_0 = arith.constant 0 : index
    %0 = vector.load %arg2[%c0, %c0_0] : memref<4x128xf32, #tpu.memory_space<vmem>>, vector<4x128xf32>
    %c0_1 = arith.constant 0 : index
    %c0_2 = arith.constant 0 : index
    %1 = vector.load %arg1[%c0_1, %c0_2] : memref<8x4xf32, #tpu.memory_space<vmem>>, vector<8x4xf32>
    %cst = arith.constant dense<0.000000e+00> : vector<8x128xf32>
    %2 = tpu.matmul %1, %0, %cst {dimension_numbers = #tpu.dot_dimension_numbers<[1], [0], [0], [1], [0, 0, 1, 1], [], []>} : vector<8x4xf32>, vector<4x128xf32>, vector<8x128xf32> -> vector<8x128xf32>
    %c0_3 = arith.constant 0 : index
    %c0_4 = arith.constant 0 : index
    %3 = vector.load %arg3[%c0_3, %c0_4] : memref<1x128xf32, #tpu.memory_space<vmem>>, vector<1x128xf32>
    %4 = vector.broadcast %3 : vector<1x128xf32> to vector<8x128xf32>
    %5 = arith.addf %2, %4 : vector<8x128xf32>
    %cst_5 = arith.constant 0.000000e+00 : f32
    %6 = vector.broadcast %cst_5 : f32 to vector<8x128xf32>
    %7 = arith.maximumf %5, %6 : vector<8x128xf32>
    %c0_6 = arith.constant 0 : index
    %c0_7 = arith.constant 0 : index
    %8 = vector.load %arg4[%c0_6, %c0_7] : memref<128x128xf32, #tpu.memory_space<vmem>>, vector<128x128xf32>
    %cst_8 = arith.constant dense<0.000000e+00> : vector<8x128xf32>
    %9 = tpu.matmul %7, %8, %cst_8 {dimension_numbers = #tpu.dot_dimension_numbers<[1], [0], [0], [1], [0, 0, 1, 1], [], []>} : vector<8x128xf32>, vector<128x128xf32>, vector<8x128xf32> -> vector<8x128xf32>
    %c0_9 = arith.constant 0 : index
    %c0_10 = arith.constant 0 : index
    %10 = vector.load %arg5[%c0_9, %c0_10] : memref<1x128xf32, #tpu.memory_space<vmem>>, vector<1x128xf32>
    %11 = vector.broadcast %10 : vector<1x128xf32> to vector<8x128xf32>
    %12 = arith.addf %9, %11 : vector<8x128xf32>
    %cst_11 = arith.constant 5.000000e-01 : f32
    %13 = vector.broadcast %cst_11 : f32 to vector<8x128xf32>
    %14 = arith.mulf %13, %12 : vector<8x128xf32>
    %15 = math.tanh %14 : vector<8x128xf32>
    %cst_12 = arith.constant 1.000000e+00 : f32
    %16 = vector.broadcast %cst_12 : f32 to vector<8x128xf32>
    %17 = arith.addf %15, %16 : vector<8x128xf32>
    %cst_13 = arith.constant 5.000000e-01 : f32
    %18 = vector.broadcast %cst_13 : f32 to vector<8x128xf32>
    %19 = arith.mulf %18, %17 : vector<8x128xf32>
    %c0_14 = arith.constant 0 : index
    %c0_15 = arith.constant 0 : index
    %20 = vector.load %arg6[%c0_14, %c0_15] : memref<128x2xf32, #tpu.memory_space<vmem>>, vector<128x2xf32>
    %cst_16 = arith.constant dense<0.000000e+00> : vector<8x2xf32>
    %21 = tpu.matmul %19, %20, %cst_16 {dimension_numbers = #tpu.dot_dimension_numbers<[1], [0], [0], [1], [0, 0, 1, 1], [], []>} : vector<8x128xf32>, vector<128x2xf32>, vector<8x2xf32> -> vector<8x2xf32>
    %c0_17 = arith.constant 0 : index
    %c0_18 = arith.constant 0 : index
    %22 = vector.load %arg7[%c0_17, %c0_18] : memref<1x2xf32, #tpu.memory_space<vmem>>, vector<1x2xf32>
    %23 = vector.broadcast %22 : vector<1x2xf32> to vector<8x2xf32>
    %24 = arith.addf %21, %23 : vector<8x2xf32>
    %25 = math.tanh %24 : vector<8x2xf32>
    %cst_19 = arith.constant 1.000000e+00 : f32
    %26 = vector.broadcast %cst_19 : f32 to vector<8x2xf32>
    %27 = arith.mulf %26, %25 : vector<8x2xf32>
    %c0_20 = arith.constant 0 : index
    %c0_21 = arith.constant 0 : index
    %28 = vector.load %arg8[%c0_20, %c0_21] : memref<8x2xf32, #tpu.memory_space<vmem>>, vector<8x2xf32>
    tpu.vector_store %arg8[%c0_20, %c0_21], %27 {strides = array<i32>} : memref<8x2xf32, #tpu.memory_space<vmem>>, vector<8x2xf32>,
    return
  }
  func.func @transform_0(%arg0: i32) -> (i32, i32) {
    %c0_i32 = arith.constant 0 : i32
    %c0_i32_0 = arith.constant 0 : i32
    return %arg0, %c0_i32 : i32, i32
  }
  func.func @transform_1(%arg0: i32) -> (i32, i32) {
    %c0_i32 = arith.constant 0 : i32
    %c0_i32_0 = arith.constant 0 : i32
    %c0_i32_1 = arith.constant 0 : i32
    return %c0_i32, %c0_i32_0 : i32, i32
  }
  func.func @transform_2(%arg0: i32) -> (i32, i32) {
    %c0_i32 = arith.constant 0 : i32
    %c0_i32_0 = arith.constant 0 : i32
    %c0_i32_1 = arith.constant 0 : i32
    return %c0_i32, %c0_i32_0 : i32, i32
  }
  func.func @transform_3(%arg0: i32) -> (i32, i32) {
    %c0_i32 = arith.constant 0 : i32
    %c0_i32_0 = arith.constant 0 : i32
    %c0_i32_1 = arith.constant 0 : i32
    return %c0_i32, %c0_i32_0 : i32, i32
  }
  func.func @transform_4(%arg0: i32) -> (i32, i32) {
    %c0_i32 = arith.constant 0 : i32
    %c0_i32_0 = arith.constant 0 : i32
    %c0_i32_1 = arith.constant 0 : i32
    return %c0_i32, %c0_i32_0 : i32, i32
  }
  func.func @transform_5(%arg0: i32) -> (i32, i32) {
    %c0_i32 = arith.constant 0 : i32
    %c0_i32_0 = arith.constant 0 : i32
    %c0_i32_1 = arith.constant 0 : i32
    return %c0_i32, %c0_i32_0 : i32, i32
  }
  func.func @transform_6(%arg0: i32) -> (i32, i32) {
    %c0_i32 = arith.constant 0 : i32
    %c0_i32_0 = arith.constant 0 : i32
    %c0_i32_1 = arith.constant 0 : i32
    return %c0_i32, %c0_i32_0 : i32, i32
  }
  func.func @transform_7(%arg0: i32) -> (i32, i32) {
    %c0_i32 = arith.constant 0 : i32
    %c0_i32_0 = arith.constant 0 : i32
    return %arg0, %c0_i32 : i32, i32
  }
}

</mosaic_0001>

<bundles_post_ra>
// kernel: actor_forward.1
= control target key start
LH: loop header
LB: loop body
LE: loop exit
PB: predicated region body
PF: predicated region fallthrough
CT: control target
= control target key end

     0   :  { %vm39_vm0 = vcmask 1043456   ;;  %vm35_vm1 = vcmask 31744   ;;  %v433_v0 = vmov 0.0   ;;  %vm434_vm2 = vmmov 0   ;;  %s628_s1 = inlined_call_operand.vmem [shape: f32[4,128], index: 1, kind: input, shape index: {}]   ;;  %s629_s0 = inlined_call_operand.vmem [shape: f32[8,4], index: 0, kind: input, shape index: {}]   ;;  %s630_s3 = inlined_call_operand.vmem [shape: f32[128,128], index: 3, kind: input, shape index: {}]   ;;  %s631_s5 = inlined_call_operand.vmem [shape: f32[128,2], index: 5, kind: input, shape index: {}]   ;;  %s632_s2 = inlined_call_operand.vmem [shape: f32[1,128], index: 2, kind: input, shape index: {}]   ;;  %s633_s4 = inlined_call_operand.vmem [shape: f32[1,128], index: 4, kind: input, shape index: {}]   ;;  %s634_s6 = inlined_call_operand.vmem [shape: f32[1,2], index: 6, kind: input, shape index: {}]   ;;  %s635_s7 = inlined_call_operand.vmem [shape: f32[8,2], index: 7, kind: output, shape index: {}]  }
   0x1   :  { %352 = vmatprep.subr.mxu0 %v433_v0  ;;  %v26_v1 = vld [vmem:[%s628_s1] sm:$0xf]  ;;  %354 = vmatprep.mubr.msk.f32.mxu0 %vm434_vm2, %v433_v0  ;;  %v129_v3 = vld [vmem:[%s630_s3 + $0x78] sm:$0xff]  ;;  %v128_v4 = vld [vmem:[%s630_s3 + $0x70] sm:$0xff]  ;;  %vm305_vm3 = vcmask 15360  }
   0x2   :  { %v27_v2 = vld [vmem:[%s629_s0] sm:$0xff]  ;;  %353 = vmatpush3.msk.msra.mxu0 %vm39_vm0, %v26_v1  ;;  %357 = vmatprep.subr.mxu1 %v433_v0  ;;  %v127_v5 = vld [vmem:[%s630_s3 + $0x68] sm:$0xff]  ;;  %v125_v7 = vld [vmem:[%s630_s3 + $0x58] sm:$0xff] }
   0x3   :  { %355 = vmatmul.mubr.msk.f32.vlgmr.msra.gmra.mxu0 %vm35_vm1, %v27_v2  ;;  %358 = vmatpush3.msra.mxu1 %v129_v3  ;;  %v126_v6 = vld [vmem:[%s630_s3 + $0x60] sm:$0xff]  ;;  %v124_v8 = vld [vmem:[%s630_s3 + $0x50] sm:$0xff]  ;;  %v123_v9 = vld [vmem:[%s630_s3 + $0x48] sm:$0xff] }
   0x4   :  { %359 = vmatprep.subr.mxu1 %v433_v0  ;;  %389 = vmatprep.mubr.msk.f32.mxu1 %vm434_vm2, %v433_v0  ;;  %v122_v10 = vld [vmem:[%s630_s3 + $0x40] sm:$0xff]  ;;  %v121_v11 = vld [vmem:[%s630_s3 + $0x38] sm:$0xff]  ;;  %v120_v12 = vld [vmem:[%s630_s3 + $0x30] sm:$0xff] }
   0x5   :  { %360 = vmatpush3.msra.mxu1 %v128_v4  ;;  %392 = vmatprep.subr.mxu0 %v433_v0  ;;  %v119_v13 = vld [vmem:[%s630_s3 + $0x28] sm:$0xff]  ;;  %v118_v14 = vld [vmem:[%s630_s3 + $0x20] sm:$0xff]  ;;  %v117_v15 = vld [vmem:[%s630_s3 + $0x18] sm:$0xff] }
   0x6   :  { %361 = vmatprep.subr.mxu1 %v433_v0  ;;  %424 = vmatprep.mubr.msk.f32.mxu0 %vm434_vm2, %v433_v0  ;;  %v116_v16 = vld [vmem:[%s630_s3 + $0x10] sm:$0xff]  ;;  %v115_v17 = vld [vmem:[%s630_s3 + $0x8] sm:$0xff]  ;;  %v114_v18 = vld [vmem:[%s630_s3] sm:$0xff] }
   0x7   :  { %362 = vmatpush3.msra.mxu1 %v127_v5  ;;  %v226_v19 = vld [vmem:[%s631_s5 + $0x78] sm:$0xff]  ;;  %v225_v20 = vld [vmem:[%s631_s5 + $0x70] sm:$0xff]  ;;  %v224_v21 = vld [vmem:[%s631_s5 + $0x68] sm:$0xff] }
   0x8   :  { %363 = vmatprep.subr.mxu1 %v433_v0  ;;  %393 = vmatpush3.msra.mxu0 %v226_v19  ;;  %v223_v22 = vld [vmem:[%s631_s5 + $0x60] sm:$0xff]  ;;  %v222_v28 = vld [vmem:[%s631_s5 + $0x58] sm:$0xff]  ;;  %v221_v29 = vld [vmem:[%s631_s5 + $0x50] sm:$0xff] }
   0x9   :  { %364 = vmatpush3.msra.mxu1 %v126_v6  ;;  %394 = vmatprep.subr.mxu0 %v433_v0  ;;  %v311_v23 = vld [vmem:[%s632_s2] ss:$0 sm:$0xff]  ;;  %v220_v30 = vld [vmem:[%s631_s5 + $0x48] sm:$0xff]  ;;  %v218_v32 = vld [vmem:[%s631_s5 + $0x38] sm:$0xff] }
   0xa   :  { %365 = vmatprep.subr.mxu1 %v433_v0  ;;  %395 = vmatpush3.msra.mxu0 %v225_v20  ;;  %v219_v31 = vld [vmem:[%s631_s5 + $0x40] sm:$0xff]  ;;  %v217_v33 = vld [vmem:[%s631_s5 + $0x30] sm:$0xff]  ;;  %v216_v34 = vld [vmem:[%s631_s5 + $0x28] sm:$0xff] }
   0xb   :  { %366 = vmatpush3.msra.mxu1 %v125_v7  ;;  %396 = vmatprep.subr.mxu0 %v433_v0  ;;  %v215_v35 = vld [vmem:[%s631_s5 + $0x20] sm:$0xff]  ;;  %v214_v36 = vld [vmem:[%s631_s5 + $0x18] sm:$0xff]  ;;  %v213_v37 = vld [vmem:[%s631_s5 + $0x10] sm:$0xff] }
   0xc   :  { %367 = vmatprep.subr.mxu1 %v433_v0  ;;  %397 = vmatpush3.msra.mxu0 %v224_v21  ;;  %v212_v38 = vld [vmem:[%s631_s5 + $0x8] sm:$0xff]  ;;  %v211_v39 = vld [vmem:[%s631_s5] sm:$0xff] }
   0xd   :  { %368 = vmatpush3.msra.mxu1 %v124_v8  ;;  %398 = vmatprep.subr.mxu0 %v433_v0  ;;  %v314_v40 = vld [vmem:[%s633_s4] ss:$0 sm:$0xff] }
   0xe   :  { %369 = vmatprep.subr.mxu1 %v433_v0  ;;  %399 = vmatpush3.msra.mxu0 %v223_v22  ;;  %v315_v48 = vld [vmem:[%s634_s6] ss:$0 sm:$0xff] }
   0xf   :  { %370 = vmatpush3.msra.mxu1 %v123_v9  ;;  %400 = vmatprep.subr.mxu0 %v433_v0 }
  0x10   :  { %371 = vmatprep.subr.mxu1 %v433_v0  ;;  %401 = vmatpush3.msra.mxu0 %v222_v28 }
  0x11   :  { %372 = vmatpush3.msra.mxu1 %v122_v10  ;;  %402 = vmatprep.subr.mxu0 %v433_v0 }
  0x12   :  { %373 = vmatprep.subr.mxu1 %v433_v0  ;;  %403 = vmatpush3.msra.mxu0 %v221_v29 }
  0x13   :  { %374 = vmatpush3.msra.mxu1 %v121_v11  ;;  %404 = vmatprep.subr.mxu0 %v433_v0 }
  0x14   :  { %375 = vmatprep.subr.mxu1 %v433_v0  ;;  %405 = vmatpush3.msra.mxu0 %v220_v30 }
  0x15   :  { %376 = vmatpush3.msra.mxu1 %v120_v12  ;;  %406 = vmatprep.subr.mxu0 %v433_v0 }
  0x16   :  { %377 = vmatprep.subr.mxu1 %v433_v0  ;;  %407 = vmatpush3.msra.mxu0 %v219_v31 }
  0x17   :  { %378 = vmatpush3.msra.mxu1 %v119_v13  ;;  %408 = vmatprep.subr.mxu0 %v433_v0 }
  0x18   :  { %379 = vmatprep.subr.mxu1 %v433_v0  ;;  %409 = vmatpush3.msra.mxu0 %v218_v32 }
  0x19   :  { %380 = vmatpush3.msra.mxu1 %v118_v14  ;;  %410 = vmatprep.subr.mxu0 %v433_v0 }
  0x1a   :  { %381 = vmatprep.subr.mxu1 %v433_v0  ;;  %411 = vmatpush3.msra.mxu0 %v217_v33 }
  0x1b   :  { %382 = vmatpush3.msra.mxu1 %v117_v15  ;;  %412 = vmatprep.subr.mxu0 %v433_v0 }
  0x1c   :  { %383 = vmatprep.subr.mxu1 %v433_v0  ;;  %413 = vmatpush3.msra.mxu0 %v216_v34 }
  0x1d   :  { %384 = vmatpush3.msra.mxu1 %v116_v16  ;;  %414 = vmatprep.subr.mxu0 %v433_v0 }
  0x1e   :  { %385 = vmatprep.subr.mxu1 %v433_v0  ;;  %415 = vmatpush3.msra.mxu0 %v215_v35 }
  0x1f   :  { %386 = vmatpush3.msra.mxu1 %v115_v17  ;;  %416 = vmatprep.subr.mxu0 %v433_v0 }
  0x20   :  { %387 = vmatprep.subr.mxu1 %v433_v0  ;;  %417 = vmatpush3.msra.mxu0 %v214_v36 }
  0x21   :  { %388 = vmatpush3.msra.mxu1 %v114_v18  ;;  %418 = vmatprep.subr.mxu0 %v433_v0 }
  0x22   :  { %419 = vmatpush3.msra.mxu0 %v213_v37 }
  0x23   :  { %420 = vmatprep.subr.mxu0 %v433_v0 }
  0x24   :  { %421 = vmatpush3.msra.mxu0 %v212_v38 }
  0x25   :  { %422 = vmatprep.subr.mxu0 %v433_v0 }
  0x26   :  { %423 = vmatpush3.msra.mxu0 %v211_v39 }
  0xc3   :  { %v109_v24 = vpop.f32.mrf.mxu0 }
  0xc4   :  { %v110_v25 = vadd.f32 %v311_v23, %v109_v24 }
  0xc5   :  { %v356_v26 = vpop.f32.mrf.mxu0 }
  0xc6   :  { %v113_v27 = vmax.f32 %v110_v25, 0.0 }
  0xc8   :  { %390 = vmatmul.mubr.f32.vlgmr.msra.gmra.mxu1 %v113_v27 }
 0x188   :  { %v203_v41 = vpop.f32.mrf.mxu1 }
 0x189   :  { %v204_v42 = vadd.f32 %v314_v40, %v203_v41 }
 0x18a   :  { %v391_v43 = vpop.f32.mrf.mxu1 }
 0x18b   :  { %v207_v44 = vmul.f32 0.5, %v204_v42 }
 0x18d   :  { %429 = vtanh.f32 %v207_v44 }
 0x19a   :  { %v430_v45 = vpop.eup %429 }
 0x19b   :  { %v209_v46 = vadd.f32 1.0, %v430_v45 }
 0x19d   :  { %v210_v47 = vmul.f32 0.5, %v209_v46 }
 0x19f   :  { %425 = vmatmul.mubr.f32.vlgmr.msra.gmra.mxu0 %v210_v47 }
 0x25f   :  { %v300_v49 = vpop.f32.mrf.mxu0 }
 0x260   :  { %v301_v50 = vadd.f32 %v315_v48, %v300_v49 }
 0x261   :  { %v426_v51 = vpop.f32.mrf.mxu0 }
 0x262   :  { %431 = vtanh.f32 %v301_v50 }
 0x26f   :  { %v432_v52 = vpop.eup %431 }
 0x270   :  { %306 = vst.msk [vmem:[%s635_s7] sm:$0xff] %vm305_vm3, %v432_v52 }

</bundles_post_ra>
